<compile_context>
chip_gen: v6e
topology: v6e:2x2x1
jax: 0.10.0
libtpu: 0.0.40
codegen_flags: <defaults>
</compile_context>

<pallas_src>
import jax
import jax.numpy as jnp
import numpy as np
from jax.experimental import pallas as pl
from jax.experimental.pallas import tpu as pltpu

_INV_SQRT2 = 0.7071067811865476


# --------------------------------------------------------------------------
# Pallas kernel
# --------------------------------------------------------------------------
def _erf_f32(x):
    # Abramowitz & Stegun 7.1.26 rational approximation, |error| < 1.5e-7.
    # Only abs / mul / add / div / exp / where (VPU + EUP ops).
    p = 0.3275911
    a1, a2, a3, a4, a5 = (0.254829592, -0.284496736, 1.421413741,
                          -1.453152027, 1.061405429)
    ax = jnp.abs(x)
    t = 1.0 / (1.0 + p * ax)
    poly = ((((a5 * t + a4) * t + a3) * t + a2) * t + a1) * t
    y = 1.0 - poly * jnp.exp(-ax * ax)
    return jnp.where(x >= 0.0, y, -y)


def _mlp_fc1_gelu_kernel(x_ref, w_ref, b_ref, o_ref):
    # x_ref: (TM, Fp) row tile     w_ref: (Fp, TN)  (already (in, out) layout)
    # b_ref: (1, TN)               o_ref: (TM, TN)
    z = (
        jnp.dot(x_ref[...], w_ref[...], preferred_element_type=jnp.float32)
        + b_ref[...]
    )
    # Exact GELU: 0.5 * z * (1 + erf(z / sqrt(2)))  -- matches nn.GELU().
    g = 0.5 * z * (1.0 + _erf_f32(z * _INV_SQRT2))
    o_ref[...] = g.astype(o_ref.dtype)
    # TODO(synk): Dropout with p > 0 would need pltpu.prng_seed /
    # prng_random_bits here; with the module default p=0.0 it is an identity.


# --------------------------------------------------------------------------
# Wrapper
# --------------------------------------------------------------------------
def _round_up(x, m):
    return ((x + m - 1) // m) * m


def _choose_tiles(M, F_pad, vmem_budget=24 * 1024 * 1024):
    """Pick (TM, TN): lane-dense, (8,128)-aligned, under a VMEM budget."""
    # Column (output-feature) panel: full width unless the weight panel
    # would be large; then 512 lanes per panel.
    TN = F_pad if F_pad <= 1024 else 512
    weight_bytes = 2 * F_pad * TN * 4            # double-buffered weight panel
    bias_bytes = 2 * 8 * TN * 4
    TM = 512
    while TM > 8:
        act_bytes = 2 * TM * F_pad * 4 + 2 * TM * TN * 4   # x + out, dbl-buf
        if weight_bytes + act_bytes + bias_bytes <= vmem_budget:
            break
        TM //= 2
    TM = max(TM, 8)
    TM = min(TM, _round_up(M, 8))
    return TM, TN


def mlp_forward(x, params):
    """Mlp forward: GELU(x @ W^T + b).  x: (..., F), W: (F, F) PyTorch layout."""
    w, b = params["w"], params["b"]
    orig_shape = x.shape
    F = orig_shape[-1]

    x2 = x.reshape(-1, F).astype(jnp.float32)
    M = x2.shape[0]

    # Pad the feature axis to a multiple of 128 (lane-dense layout); zero
    # padding of x / W / b leaves the valid columns numerically unchanged.
    F_pad = _round_up(F, 128)
    TM, TN = _choose_tiles(M, F_pad)
    M_pad = _round_up(M, TM)

    if M_pad != M or F_pad != F:
        x2 = jnp.pad(x2, ((0, M_pad - M), (0, F_pad - F)))

    w_io = jnp.transpose(w).astype(jnp.float32)          # (in, out) for x @ W
    if F_pad != F:
        w_io = jnp.pad(w_io, ((0, F_pad - F), (0, F_pad - F)))
    b2 = b.astype(jnp.float32).reshape(1, F)
    if F_pad != F:
        b2 = jnp.pad(b2, ((0, 0), (0, F_pad - F)))

    grid = (F_pad // TN, M_pad // TM)   # columns outer, rows inner (fastest)

    out = pl.pallas_call(
        _mlp_fc1_gelu_kernel,
        out_shape=jax.ShapeDtypeStruct((M_pad, F_pad), jnp.float32),
        grid=grid,
        in_specs=[
            pl.BlockSpec((TM, F_pad), lambda j, i: (i, 0)),   # activation rows
            pl.BlockSpec((F_pad, TN), lambda j, i: (0, j)),   # weight panel (resident over row sweep)
            pl.BlockSpec((1, TN), lambda j, i: (0, j)),       # bias panel
        ],
        out_specs=pl.BlockSpec((TM, TN), lambda j, i: (i, j)),
        compiler_params=pltpu.CompilerParams(
            dimension_semantics=("parallel", "parallel"),     # megacore sharding
            vmem_limit_bytes=32 * 1024 * 1024,
        ),
    )(x2, w_io, b2)

    if M_pad != M or F_pad != F:
        out = out[:M, :F]
    return out.reshape(orig_shape)


# --------------------------------------------------------------------------
# Deterministic parameter init (synthetic; no checkpoint load)
# --------------------------------------------------------------------------
def init_params(key, in_features):
    kw, kb = jax.random.split(key)
    return dict(
        w=0.1 * jax.random.normal(kw, (in_features, in_features), jnp.float32),
        b=0.1 * jax.random.normal(kb, (in_features,), jnp.float32),
    )


# --------------------------------------------------------------------------
# Pure-JAX reference (mirrors PyTorch semantics) for a correctness check
# --------------------------------------------------------------------------
def _reference(x, params):
    w, b = params["w"], params["b"]
    z = x.astype(jnp.float32) @ w.T + b
    # Exact GELU (nn.GELU() default, approximate='none'); Dropout(0.0) = id.
    return 0.5 * z * (1.0 + jax.scipy.special.erf(z * _INV_SQRT2))


# --------------------------------------------------------------------------
if __name__ == "__main__":
    key = jax.random.PRNGKey(0)
    kx, kp = jax.random.split(key)

    B, S, Fdim = 2, 8, 32                       # batch, seq, hidden
    x = jax.random.normal(kx, (B, S, Fdim), jnp.float32)
    params = init_params(kp, Fdim)

    out = jax.jit(mlp_forward)(x, params)
    out = jax.block_until_ready(out)

    assert out.shape == (B, S, Fdim), out.shape

    ref = _reference(x, params)
    np.testing.assert_allclose(np.asarray(out), np.asarray(ref),
                               atol=2e-4, rtol=2e-4)

    print("KERNEL_OK")
</pallas_src>

<mosaic_0001>
module attributes {stable_mosaic.version = 11 : i64} {
  func.func @_mlp_fc1_gelu_kernel(%arg0: i32, %arg1: i32, %arg2: memref<16x128xf32, #tpu.memory_space<vmem>>, %arg3: memref<128x128xf32, #tpu.memory_space<vmem>>, %arg4: memref<1x128xf32, #tpu.memory_space<vmem>>, %arg5: memref<16x128xf32, #tpu.memory_space<vmem>>) attributes {dimension_semantics = [#tpu.dimension_semantics<parallel>, #tpu.dimension_semantics<parallel>], iteration_bounds = array<i64: 1, 1>, scalar_prefetch = 0 : i64, scratch_operands = 0 : i64, tpu.core_type = #tpu.core_type<tc>, window_params = [{transform_indices = @transform_0, window_bounds = array<i64: 16, 128>}, {transform_indices = @transform_1, window_bounds = array<i64: 128, 128>}, {transform_indices = @transform_2, window_bounds = array<i64: 1, 128>}, {transform_indices = @transform_3, window_bounds = array<i64: 16, 128>}]} {
    %c0 = arith.constant 0 : index
    %c0_0 = arith.constant 0 : index
    %0 = vector.load %arg2[%c0, %c0_0] : memref<16x128xf32, #tpu.memory_space<vmem>>, vector<16x128xf32>
    %c0_1 = arith.constant 0 : index
    %c0_2 = arith.constant 0 : index
    %1 = vector.load %arg3[%c0_1, %c0_2] : memref<128x128xf32, #tpu.memory_space<vmem>>, vector<128x128xf32>
    %cst = arith.constant dense<0.000000e+00> : vector<16x128xf32>
    %2 = tpu.matmul %0, %1, %cst {dimension_numbers = #tpu.dot_dimension_numbers<[1], [0], [0], [1], [0, 0, 1, 1], [], []>} : vector<16x128xf32>, vector<128x128xf32>, vector<16x128xf32> -> vector<16x128xf32>
    %c0_3 = arith.constant 0 : index
    %c0_4 = arith.constant 0 : index
    %3 = vector.load %arg4[%c0_3, %c0_4] : memref<1x128xf32, #tpu.memory_space<vmem>>, vector<1x128xf32>
    %4 = vector.broadcast %3 : vector<1x128xf32> to vector<16x128xf32>
    %5 = arith.addf %2, %4 : vector<16x128xf32>
    %cst_5 = arith.constant 5.000000e-01 : f32
    %6 = vector.broadcast %cst_5 : f32 to vector<16x128xf32>
    %7 = arith.mulf %6, %5 : vector<16x128xf32>
    %cst_6 = arith.constant 0.707106769 : f32
    %8 = vector.broadcast %cst_6 : f32 to vector<16x128xf32>
    %9 = arith.mulf %5, %8 : vector<16x128xf32>
    %10 = math.absf %9 : vector<16x128xf32>
    %cst_7 = arith.constant 0.327591091 : f32
    %11 = vector.broadcast %cst_7 : f32 to vector<16x128xf32>
    %12 = arith.mulf %11, %10 : vector<16x128xf32>
    %cst_8 = arith.constant 1.000000e+00 : f32
    %13 = vector.broadcast %cst_8 : f32 to vector<16x128xf32>
    %14 = arith.addf %13, %12 : vector<16x128xf32>
    %cst_9 = arith.constant 1.000000e+00 : f32
    %15 = vector.broadcast %cst_9 : f32 to vector<16x128xf32>
    %16 = arith.divf %15, %14 : vector<16x128xf32>
    %cst_10 = arith.constant 1.06140542 : f32
    %17 = vector.broadcast %cst_10 : f32 to vector<16x128xf32>
    %18 = arith.mulf %17, %16 : vector<16x128xf32>
    %cst_11 = arith.constant -1.45315206 : f32
    %19 = vector.broadcast %cst_11 : f32 to vector<16x128xf32>
    %20 = arith.addf %18, %19 : vector<16x128xf32>
    %21 = arith.mulf %20, %16 : vector<16x128xf32>
    %cst_12 = arith.constant 1.42141378 : f32
    %22 = vector.broadcast %cst_12 : f32 to vector<16x128xf32>
    %23 = arith.addf %21, %22 : vector<16x128xf32>
    %24 = arith.mulf %23, %16 : vector<16x128xf32>
    %cst_13 = arith.constant -0.284496725 : f32
    %25 = vector.broadcast %cst_13 : f32 to vector<16x128xf32>
    %26 = arith.addf %24, %25 : vector<16x128xf32>
    %27 = arith.mulf %26, %16 : vector<16x128xf32>
    %cst_14 = arith.constant 0.254829586 : f32
    %28 = vector.broadcast %cst_14 : f32 to vector<16x128xf32>
    %29 = arith.addf %27, %28 : vector<16x128xf32>
    %30 = arith.mulf %29, %16 : vector<16x128xf32>
    %cst_15 = arith.constant 0.000000e+00 : f32
    %31 = vector.broadcast %cst_15 : f32 to vector<16x128xf32>
    %32 = arith.subf %31, %10 : vector<16x128xf32>
    %33 = arith.mulf %32, %10 : vector<16x128xf32>
    %34 = math.exp %33 : vector<16x128xf32>
    %35 = arith.mulf %30, %34 : vector<16x128xf32>
    %cst_16 = arith.constant 1.000000e+00 : f32
    %36 = vector.broadcast %cst_16 : f32 to vector<16x128xf32>
    %37 = arith.subf %36, %35 : vector<16x128xf32>
    %cst_17 = arith.constant 0.000000e+00 : f32
    %38 = vector.broadcast %cst_17 : f32 to vector<16x128xf32>
    %39 = arith.cmpf oge, %9, %38 : vector<16x128xf32>
    %cst_18 = arith.constant 0.000000e+00 : f32
    %40 = vector.broadcast %cst_18 : f32 to vector<16x128xf32>
    %41 = arith.subf %40, %37 : vector<16x128xf32>
    %42 = arith.select %39, %37, %41 : vector<16x128xi1>, vector<16x128xf32>
    %cst_19 = arith.constant 1.000000e+00 : f32
    %43 = vector.broadcast %cst_19 : f32 to vector<16x128xf32>
    %44 = arith.addf %43, %42 : vector<16x128xf32>
    %45 = arith.mulf %7, %44 : vector<16x128xf32>
    %c0_20 = arith.constant 0 : index
    %c0_21 = arith.constant 0 : index
    %46 = vector.load %arg5[%c0_20, %c0_21] : memref<16x128xf32, #tpu.memory_space<vmem>>, vector<16x128xf32>
    tpu.vector_store %arg5[%c0_20, %c0_21], %45 {strides = array<i32>} : memref<16x128xf32, #tpu.memory_space<vmem>>, vector<16x128xf32>,
    return
  }
  func.func @transform_0(%arg0: i32, %arg1: i32) -> (i32, i32) {
    %c0_i32 = arith.constant 0 : i32
    %c0_i32_0 = arith.constant 0 : i32
    return %arg1, %c0_i32 : i32, i32
  }
  func.func @transform_1(%arg0: i32, %arg1: i32) -> (i32, i32) {
    %c0_i32 = arith.constant 0 : i32
    %c0_i32_0 = arith.constant 0 : i32
    return %c0_i32, %arg0 : i32, i32
  }
  func.func @transform_2(%arg0: i32, %arg1: i32) -> (i32, i32) {
    %c0_i32 = arith.constant 0 : i32
    %c0_i32_0 = arith.constant 0 : i32
    return %c0_i32, %arg0 : i32, i32
  }
  func.func @transform_3(%arg0: i32, %arg1: i32) -> (i32, i32) {
    %c0_i32 = arith.constant 0 : i32
    return %arg1, %arg0 : i32, i32
  }
}

</mosaic_0001>

<bundles_post_ra>
// kernel: mlp_forward.1
= control target key start
LH: loop header
LB: loop body
LE: loop exit
PB: predicated region body
PF: predicated region fallthrough
CT: control target
= control target key end

     0   :  { %s319_s1 = inlined_call_operand.vmem [shape: f32[128,128], index: 1, kind: input, shape index: {}]   ;;  %s320_s0 = inlined_call_operand.vmem [shape: f32[16,128], index: 0, kind: input, shape index: {}]   ;;  %s321_s2 = inlined_call_operand.vmem [shape: f32[1,128], index: 2, kind: input, shape index: {}]   ;;  %s322_s3 = inlined_call_operand.vmem [shape: f32[16,128], index: 3, kind: output, shape index: {}]  }
   0x1   :  { %v31_v0 = vld [vmem:[%s319_s1 + $0x78] sm:$0xff]  ;;  %v30_v1 = vld [vmem:[%s319_s1 + $0x70] sm:$0xff]  ;;  %v29_v2 = vld [vmem:[%s319_s1 + $0x68] sm:$0xff] }
   0x2   :  { %193 = vmatprep.subr.mxu0 %v31_v0  ;;  %v28_v3 = vld [vmem:[%s319_s1 + $0x60] sm:$0xff]  ;;  %v27_v5 = vld [vmem:[%s319_s1 + $0x58] sm:$0xff]  ;;  %v26_v6 = vld [vmem:[%s319_s1 + $0x50] sm:$0xff] }
   0x3   :  { %194 = vmatpush3.msra.mxu0 %v31_v0  ;;  %v14_v4 = vld [vmem:[%s320_s0] sm:$0xff]  ;;  %v25_v7 = vld [vmem:[%s319_s1 + $0x48] sm:$0xff]  ;;  %v23_v9 = vld [vmem:[%s319_s1 + $0x38] sm:$0xff] }
   0x4   :  { %195 = vmatprep.subr.mxu0 %v30_v1  ;;  %225 = vmatprep.mubr.f32.mxu0 %v14_v4  ;;  %v24_v8 = vld [vmem:[%s319_s1 + $0x40] sm:$0xff]  ;;  %v22_v10 = vld [vmem:[%s319_s1 + $0x30] sm:$0xff]  ;;  %v21_v11 = vld [vmem:[%s319_s1 + $0x28] sm:$0xff] }
   0x5   :  { %196 = vmatpush3.msra.mxu0 %v30_v1  ;;  %v20_v12 = vld [vmem:[%s319_s1 + $0x20] sm:$0xff]  ;;  %v19_v13 = vld [vmem:[%s319_s1 + $0x18] sm:$0xff]  ;;  %v18_v14 = vld [vmem:[%s319_s1 + $0x10] sm:$0xff] }
   0x6   :  { %197 = vmatprep.subr.mxu0 %v29_v2  ;;  %v17_v15 = vld [vmem:[%s319_s1 + $0x8] sm:$0xff]  ;;  %v16_v16 = vld [vmem:[%s319_s1] sm:$0xff] }
   0x7   :  { %198 = vmatpush3.msra.mxu0 %v29_v2  ;;  %v15_v17 = vld [vmem:[%s320_s0 + $0x8] sm:$0xff]  ;;  %v174_v18 = vld [vmem:[%s321_s2] ss:$0 sm:$0xff] }
   0x8   :  { %199 = vmatprep.subr.mxu0 %v28_v3 }
   0x9   :  { %200 = vmatpush3.msra.mxu0 %v28_v3 }
   0xa   :  { %201 = vmatprep.subr.mxu0 %v27_v5 }
   0xb   :  { %202 = vmatpush3.msra.mxu0 %v27_v5 }
   0xc   :  { %203 = vmatprep.subr.mxu0 %v26_v6 }
   0xd   :  { %204 = vmatpush3.msra.mxu0 %v26_v6 }
   0xe   :  { %205 = vmatprep.subr.mxu0 %v25_v7 }
   0xf   :  { %206 = vmatpush3.msra.mxu0 %v25_v7 }
  0x10   :  { %207 = vmatprep.subr.mxu0 %v24_v8 }
  0x11   :  { %208 = vmatpush3.msra.mxu0 %v24_v8 }
  0x12   :  { %209 = vmatprep.subr.mxu0 %v23_v9 }
  0x13   :  { %210 = vmatpush3.msra.mxu0 %v23_v9 }
  0x14   :  { %211 = vmatprep.subr.mxu0 %v22_v10 }
  0x15   :  { %212 = vmatpush3.msra.mxu0 %v22_v10 }
  0x16   :  { %213 = vmatprep.subr.mxu0 %v21_v11 }
  0x17   :  { %214 = vmatpush3.msra.mxu0 %v21_v11 }
  0x18   :  { %215 = vmatprep.subr.mxu0 %v20_v12 }
  0x19   :  { %216 = vmatpush3.msra.mxu0 %v20_v12 }
  0x1a   :  { %217 = vmatprep.subr.mxu0 %v19_v13 }
  0x1b   :  { %218 = vmatpush3.msra.mxu0 %v19_v13 }
  0x1c   :  { %219 = vmatprep.subr.mxu0 %v18_v14 }
  0x1d   :  { %220 = vmatpush3.msra.mxu0 %v18_v14 }
  0x1e   :  { %221 = vmatprep.subr.mxu0 %v17_v15 }
  0x1f   :  { %222 = vmatpush3.msra.mxu0 %v17_v15 }
  0x20   :  { %223 = vmatprep.subr.mxu0 %v16_v16 }
  0x21   :  { %224 = vmatpush3.msra.mxu0 %v16_v16 }
  0x22   :  { %226 = vmatmul.mubr.f32.vlgmr.msra.gmra.mxu0 %v15_v17 }
  0xe2   :  { %v227_v19 = vpop.f32.mrf.mxu0 }
  0xe3   :  { %v111_v20 = vadd.f32 %v227_v19, %v174_v18 }
  0xe4   :  { %v105_v21 = vpop.f32.mrf.mxu0 }
  0xe5   :  { %v117_v22 = vmul.f32 0.70710677, %v111_v20  ;;  %v106_v23 = vadd.f32 %v174_v18, %v105_v21  ;;  %v115_v1 = vmul.f32 0.5, %v111_v20 }
  0xe7   :  { %v119_v24 = vand.u32 2147483647, %v117_v22  ;;  %v116_v25 = vmul.f32 0.70710677, %v106_v23  ;;  %vm159_vm0 = vcmp.ge.f32.partialorder %v117_v22, 0.0  ;;  %v114_v6 = vmul.f32 0.5, %v106_v23 }
  0xe9   :  { %v121_v26 = vmul.f32 0.3275911, %v119_v24  ;;  %v118_v27 = vand.u32 2147483647, %v116_v25  ;;  %v147_v31 = vsub.f32 0.0, %v119_v24  ;;  %vm158_vm1 = vcmp.ge.f32.partialorder %v116_v25, 0.0 }
  0xeb   :  { %v123_v28 = vadd.f32 1.0, %v121_v26  ;;  %v120_v29 = vmul.f32 0.3275911, %v118_v27  ;;  %v146_v32 = vsub.f32 0.0, %v118_v27  ;;  %v149_v33 = vmul.f32 %v147_v31, %v119_v24 }
  0xed   :  { %228 = vrcp.f32 %v123_v28  ;;  %v122_v30 = vadd.f32 1.0, %v120_v29  ;;  %v148_v35 = vmul.f32 %v146_v32, %v118_v27  ;;  %v152_v37 = vmul.f32 1.442695, %v149_v33 }
  0xef   :  { %230 = vrcp.f32 %v122_v30  ;;  %v150_v41 = vmul.f32 1.442695, %v148_v35 }
  0xf0   :  { %232 = vpow2.f32 %v152_v37 }
  0xf1   :  { %234 = vpow2.f32 %v150_v41 }
  0xfa   :  { %v229_v34 = vpop.eup %228 }
  0xfb   :  { %v129_v36 = vmul.f32 1.0614054, %v229_v34 }
  0xfc   :  { %v231_v38 = vpop.eup %230 }
  0xfd   :  { %v131_v39 = vadd.f32 -1.4531521, %v129_v36  ;;  %v128_v40 = vmul.f32 1.0614054, %v231_v38  ;;  %v233_v55 = vpop.eup %232 }
  0xfe   :  { %v235_v59 = vpop.eup %234 }
  0xff   :  { %v133_v42 = vmul.f32 %v229_v34, %v131_v39  ;;  %v130_v43 = vadd.f32 -1.4531521, %v128_v40 }
 0x101   :  { %v135_v44 = vadd.f32 1.4214138, %v133_v42  ;;  %v132_v45 = vmul.f32 %v231_v38, %v130_v43 }
 0x103   :  { %v137_v46 = vmul.f32 %v229_v34, %v135_v44  ;;  %v134_v47 = vadd.f32 1.4214138, %v132_v45 }
 0x105   :  { %v139_v48 = vadd.f32 -0.28449672, %v137_v46  ;;  %v136_v49 = vmul.f32 %v231_v38, %v134_v47 }
 0x107   :  { %v141_v50 = vmul.f32 %v229_v34, %v139_v48  ;;  %v138_v51 = vadd.f32 -0.28449672, %v136_v49 }
 0x109   :  { %v143_v52 = vadd.f32 0.2548296, %v141_v50  ;;  %v140_v53 = vmul.f32 %v231_v38, %v138_v51 }
 0x10b   :  { %v145_v54 = vmul.f32 %v229_v34, %v143_v52  ;;  %v142_v56 = vadd.f32 0.2548296, %v140_v53 }
 0x10d   :  { %v155_v57 = vmul.f32 %v233_v55, %v145_v54  ;;  %v144_v58 = vmul.f32 %v231_v38, %v142_v56 }
 0x10f   :  { %v157_v60 = vsub.f32 1.0, %v155_v57  ;;  %v154_v61 = vmul.f32 %v235_v59, %v144_v58 }
 0x111   :  { %v161_v62 = vsub.f32 0.0, %v157_v60  ;;  %v156_v63 = vsub.f32 1.0, %v154_v61 }
 0x113   :  { %v163_v0 = vsel %vm159_vm0, %v157_v60, %v161_v62  ;;  %v160_v3 = vsub.f32 0.0, %v156_v63 }
 0x114   :  { %v165_v2 = vadd.f32 1.0, %v163_v0 }
 0x115   :  { %v162_v5 = vsel %vm158_vm1, %v156_v63, %v160_v3 }
 0x116   :  { %v167_v4 = vmul.f32 %v165_v2, %v115_v1  ;;  %v164_v7 = vadd.f32 1.0, %v162_v5 }
 0x118   :  { %169 = vst [vmem:[%s322_s3 + $0x8] sm:$0xff] %v167_v4  ;;  %v166_v8 = vmul.f32 %v164_v7, %v114_v6 }
 0x11a   :  { %168 = vst [vmem:[%s322_s3] sm:$0xff] %v166_v8 }

</bundles_post_ra>
